<compile_context>
chip_gen: v6e
topology: v6e:2x2x1
jax: 0.10.0
libtpu: 0.0.40
codegen_flags: <defaults>
</compile_context>

<pallas_src>
import functools

import jax
import jax.numpy as jnp
import numpy as np
from jax import lax
from jax.experimental import pallas as pl
from jax.experimental.pallas import tpu as pltpu


def _round_up(x, m):
    return ((x + m - 1) // m) * m


def _conv_bn_matmul_kernel(p_ref, w_ref, scale_ref, bias_ref, o_ref, acc_ref):
    """One (tM, tN) output tile: acc += p @ w over the K grid axis; on the last
    K step apply folded BatchNorm (per-channel scale/bias) + LeakyReLU(0.1)."""

    @pl.when(pl.program_id(2) == 0)
    def _init():
        acc_ref[...] = jnp.zeros_like(acc_ref)

    acc_ref[...] += jnp.dot(p_ref[...], w_ref[...],
                            preferred_element_type=jnp.float32)

    @pl.when(pl.program_id(2) == pl.num_programs(2) - 1)
    def _finalize():
        y = acc_ref[...] * scale_ref[...] + bias_ref[...]   # folded BN
        o_ref[...] = jnp.where(y >= 0, y, 0.1 * y).astype(o_ref.dtype)


def conv_bn_forward(x_nchw, w_oihw, gamma, beta, running_mean, running_var,
                    *, stride=1, eps=1e-5, mxu_dtype=jnp.float32):
    """Forward of _conv_bn. x_nchw: (N, Cin, H, W) float32 -> (N, Cout, Ho, Wo)."""
    N, Cin, H, W = x_nchw.shape
    Cout = w_oihw.shape[0]
    Ho = (H + 2 * 1 - 3) // stride + 1
    Wo = (W + 2 * 1 - 3) // stride + 1

    # ---- plain-JAX glue: im2col packing (pad fused into patch extraction) ----
    x_nhwc = jnp.transpose(x_nchw, (0, 2, 3, 1))                  # (N, H, W, Cin)
    x_pad = jnp.pad(x_nhwc, ((0, 0), (1, 1), (1, 1), (0, 0)))     # (N, H+2, W+2, Cin)
    taps = []
    for kh in range(3):
        for kw in range(3):
            taps.append(x_pad[:, kh:kh + (Ho - 1) * stride + 1:stride,
                              kw:kw + (Wo - 1) * stride + 1:stride, :])  # (N,Ho,Wo,Cin)
    patches = jnp.concatenate(taps, axis=-1)                      # (N, Ho, Wo, 9*Cin)

    K = 9 * Cin
    M = N * Ho * Wo
    patches = patches.reshape(M, K)

    # Weights repacked to (K, Cout), K-ordering matching `patches` (kh, kw, Cin).
    w_k = jnp.transpose(w_oihw, (2, 3, 1, 0)).reshape(K, Cout)

    # Folded BatchNorm (inference): y = conv * scale + bias.
    scale = gamma / jnp.sqrt(running_var + eps)                   # (Cout,)
    bias = beta - running_mean * scale                            # (Cout,)

    # ---- tile / pad sizes (lane-dense, VMEM-bounded) ----
    if K <= 512:
        Kp = _round_up(K, 128)
        tk = Kp
    else:
        Kp = _round_up(K, 512)
        tk = 512
    Np = _round_up(Cout, 128)
    tN = 256 if Np % 256 == 0 else 128
    tM = 256 if M >= 256 else _round_up(M, 8)
    M_pad = _round_up(M, tM)

    patches_p = jnp.pad(patches, ((0, M_pad - M), (0, Kp - K))).astype(mxu_dtype)
    w_p = jnp.pad(w_k, ((0, Kp - K), (0, Np - Cout))).astype(mxu_dtype)
    scale_p = jnp.pad(scale, (0, Np - Cout), constant_values=1.0
                      ).reshape(1, Np).astype(jnp.float32)
    bias_p = jnp.pad(bias, (0, Np - Cout)).reshape(1, Np).astype(jnp.float32)

    grid = (M_pad // tM, Np // tN, Kp // tk)

    out_pad = pl.pallas_call(
        _conv_bn_matmul_kernel,
        out_shape=jax.ShapeDtypeStruct((M_pad, Np), jnp.float32),
        grid_spec=pltpu.PrefetchScalarGridSpec(
            num_scalar_prefetch=0,
            grid=grid,
            in_specs=[
                pl.BlockSpec((tM, tk), lambda i, j, k: (i, k)),   # im2col patches
                pl.BlockSpec((tk, tN), lambda i, j, k: (k, j)),   # weights
                pl.BlockSpec((1, tN), lambda i, j, k: (0, j)),    # BN scale
                pl.BlockSpec((1, tN), lambda i, j, k: (0, j)),    # BN bias
            ],
            out_specs=pl.BlockSpec((tM, tN), lambda i, j, k: (i, j)),
            scratch_shapes=[pltpu.VMEM((tM, tN), jnp.float32)],
        ),
        compiler_params=pltpu.CompilerParams(
            dimension_semantics=("parallel", "parallel", "arbitrary"),
            vmem_limit_bytes=32 * 1024 * 1024,
        ),
    )(patches_p, w_p, scale_p, bias_p)

    out = out_pad[:M, :Cout].reshape(N, Ho, Wo, Cout)             # drop padding
    return jnp.transpose(out, (0, 3, 1, 2))                       # back to NCHW


def _reference(x_nchw, w_oihw, gamma, beta, running_mean, running_var,
               *, stride=1, eps=1e-5):
    y = lax.conv_general_dilated(
        x_nchw, w_oihw, window_strides=(stride, stride),
        padding=((1, 1), (1, 1)),
        dimension_numbers=("NCHW", "OIHW", "NCHW"))
    scale = (gamma / jnp.sqrt(running_var + eps)).reshape(1, -1, 1, 1)
    bias = (beta - running_mean * gamma / jnp.sqrt(running_var + eps)).reshape(1, -1, 1, 1)
    y = y * scale + bias
    return jnp.where(y >= 0, y, 0.1 * y)


if __name__ == "__main__":
    key = jax.random.PRNGKey(0)
    N, Cin, H, W = 2, 4, 16, 16
    Cout = 8
    stride = 1

    k1, k2, k3, k4, k5, k6 = jax.random.split(key, 6)
    x = jax.random.normal(k1, (N, Cin, H, W), dtype=jnp.float32)
    # Conv2d(inp, oup, 3) weight shape: (oup, inp, 3, 3), no bias.
    w = jax.random.normal(k2, (Cout, Cin, 3, 3), dtype=jnp.float32) * 0.1
    # BatchNorm2d(oup) parameters / running stats (deterministic).
    gamma = 1.0 + 0.1 * jax.random.normal(k3, (Cout,), dtype=jnp.float32)
    beta = 0.1 * jax.random.normal(k4, (Cout,), dtype=jnp.float32)
    running_mean = 0.1 * jax.random.normal(k5, (Cout,), dtype=jnp.float32)
    running_var = jnp.abs(1.0 + 0.1 * jax.random.normal(k6, (Cout,), dtype=jnp.float32))

    out = conv_bn_forward(x, w, gamma, beta, running_mean, running_var, stride=stride)
    out = jax.block_until_ready(out)

    ref = _reference(x, w, gamma, beta, running_mean, running_var, stride=stride)
    np.testing.assert_allclose(np.asarray(out), np.asarray(ref), rtol=1e-4, atol=1e-4)

    print("KERNEL_OK")
</pallas_src>

<mosaic_0001>
module attributes {stable_mosaic.version = 11 : i64} {
  func.func @_conv_bn_matmul_kernel(%arg0: i32, %arg1: i32, %arg2: i32, %arg3: memref<256x128xf32, #tpu.memory_space<vmem>>, %arg4: memref<128x128xf32, #tpu.memory_space<vmem>>, %arg5: memref<1x128xf32, #tpu.memory_space<vmem>>, %arg6: memref<1x128xf32, #tpu.memory_space<vmem>>, %arg7: memref<256x128xf32, #tpu.memory_space<vmem>>, %arg8: memref<256x128xf32, #tpu.memory_space<vmem>>) attributes {dimension_semantics = [#tpu.dimension_semantics<parallel>, #tpu.dimension_semantics<parallel>, #tpu.dimension_semantics<arbitrary>], iteration_bounds = array<i64: 2, 1, 1>, scalar_prefetch = 0 : i64, scratch_operands = 1 : i64, tpu.core_type = #tpu.core_type<tc>, window_params = [{transform_indices = @transform_0, window_bounds = array<i64: 256, 128>}, {transform_indices = @transform_1, window_bounds = array<i64: 128, 128>}, {transform_indices = @transform_2, window_bounds = array<i64: 1, 128>}, {transform_indices = @transform_3, window_bounds = array<i64: 1, 128>}, {transform_indices = @transform_4, window_bounds = array<i64: 256, 128>}]} {
    %c0_i32 = arith.constant 0 : i32
    %0 = arith.cmpi eq, %arg2, %c0_i32 : i32
    %1 = arith.extui %0 : i1 to i32
    %c0_i32_0 = arith.constant 0 : i32
    %2 = arith.cmpi ne, %1, %c0_i32_0 : i32
    scf.if %2 {
      %cst_10 = arith.constant 0.000000e+00 : f32
      %12 = vector.broadcast %cst_10 : f32 to vector<256x128xf32>
      %c0_11 = arith.constant 0 : index
      %c0_12 = arith.constant 0 : index
      %13 = vector.load %arg8[%c0_11, %c0_12] : memref<256x128xf32, #tpu.memory_space<vmem>>, vector<256x128xf32>
      tpu.vector_store %arg8[%c0_11, %c0_12], %12 {strides = array<i32>} : memref<256x128xf32, #tpu.memory_space<vmem>>, vector<256x128xf32>,
    } else {
    }
    %c0 = arith.constant 0 : index
    %c0_1 = arith.constant 0 : index
    %3 = vector.load %arg8[%c0, %c0_1] : memref<256x128xf32, #tpu.memory_space<vmem>>, vector<256x128xf32>
    %c0_2 = arith.constant 0 : index
    %c0_3 = arith.constant 0 : index
    %4 = vector.load %arg3[%c0_2, %c0_3] : memref<256x128xf32, #tpu.memory_space<vmem>>, vector<256x128xf32>
    %c0_4 = arith.constant 0 : index
    %c0_5 = arith.constant 0 : index
    %5 = vector.load %arg4[%c0_4, %c0_5] : memref<128x128xf32, #tpu.memory_space<vmem>>, vector<128x128xf32>
    %cst = arith.constant dense<0.000000e+00> : vector<256x128xf32>
    %6 = tpu.matmul %4, %5, %cst {dimension_numbers = #tpu.dot_dimension_numbers<[1], [0], [0], [1], [0, 0, 1, 1], [], []>} : vector<256x128xf32>, vector<128x128xf32>, vector<256x128xf32> -> vector<256x128xf32>
    %7 = arith.addf %3, %6 : vector<256x128xf32>
    %c0_6 = arith.constant 0 : index
    %c0_7 = arith.constant 0 : index
    %8 = vector.load %arg8[%c0_6, %c0_7] : memref<256x128xf32, #tpu.memory_space<vmem>>, vector<256x128xf32>
    tpu.vector_store %arg8[%c0_6, %c0_7], %7 {strides = array<i32>} : memref<256x128xf32, #tpu.memory_space<vmem>>, vector<256x128xf32>,
    %c0_i32_8 = arith.constant 0 : i32
    %9 = arith.cmpi eq, %arg2, %c0_i32_8 : i32
    %10 = arith.extui %9 : i1 to i32
    %c0_i32_9 = arith.constant 0 : i32
    %11 = arith.cmpi ne, %10, %c0_i32_9 : i32
    scf.if %11 {
      %c0_10 = arith.constant 0 : index
      %c0_11 = arith.constant 0 : index
      %12 = vector.load %arg8[%c0_10, %c0_11] : memref<256x128xf32, #tpu.memory_space<vmem>>, vector<256x128xf32>
      %c0_12 = arith.constant 0 : index
      %c0_13 = arith.constant 0 : index
      %13 = vector.load %arg5[%c0_12, %c0_13] : memref<1x128xf32, #tpu.memory_space<vmem>>, vector<1x128xf32>
      %14 = vector.broadcast %13 : vector<1x128xf32> to vector<256x128xf32>
      %15 = arith.mulf %12, %14 : vector<256x128xf32>
      %c0_14 = arith.constant 0 : index
      %c0_15 = arith.constant 0 : index
      %16 = vector.load %arg6[%c0_14, %c0_15] : memref<1x128xf32, #tpu.memory_space<vmem>>, vector<1x128xf32>
      %17 = vector.broadcast %16 : vector<1x128xf32> to vector<256x128xf32>
      %18 = arith.addf %15, %17 : vector<256x128xf32>
      %cst_16 = arith.constant 0.000000e+00 : f32
      %19 = vector.broadcast %cst_16 : f32 to vector<256x128xf32>
      %20 = arith.cmpf oge, %18, %19 : vector<256x128xf32>
      %cst_17 = arith.constant 1.000000e-01 : f32
      %21 = vector.broadcast %cst_17 : f32 to vector<256x128xf32>
      %22 = arith.mulf %21, %18 : vector<256x128xf32>
      %23 = arith.select %20, %18, %22 : vector<256x128xi1>, vector<256x128xf32>
      %c0_18 = arith.constant 0 : index
      %c0_19 = arith.constant 0 : index
      %24 = vector.load %arg7[%c0_18, %c0_19] : memref<256x128xf32, #tpu.memory_space<vmem>>, vector<256x128xf32>
      tpu.vector_store %arg7[%c0_18, %c0_19], %23 {strides = array<i32>} : memref<256x128xf32, #tpu.memory_space<vmem>>, vector<256x128xf32>,
    } else {
    }
    return
  }
  func.func @transform_0(%arg0: i32, %arg1: i32, %arg2: i32) -> (i32, i32) {
    %c0_i32 = arith.constant 0 : i32
    return %arg0, %arg2 : i32, i32
  }
  func.func @transform_1(%arg0: i32, %arg1: i32, %arg2: i32) -> (i32, i32) {
    %c0_i32 = arith.constant 0 : i32
    return %arg2, %arg1 : i32, i32
  }
  func.func @transform_2(%arg0: i32, %arg1: i32, %arg2: i32) -> (i32, i32) {
    %c0_i32 = arith.constant 0 : i32
    %c0_i32_0 = arith.constant 0 : i32
    return %c0_i32, %arg1 : i32, i32
  }
  func.func @transform_3(%arg0: i32, %arg1: i32, %arg2: i32) -> (i32, i32) {
    %c0_i32 = arith.constant 0 : i32
    %c0_i32_0 = arith.constant 0 : i32
    return %c0_i32, %arg1 : i32, i32
  }
  func.func @transform_4(%arg0: i32, %arg1: i32, %arg2: i32) -> (i32, i32) {
    %c0_i32 = arith.constant 0 : i32
    return %arg0, %arg1 : i32, i32
  }
}

</mosaic_0001>

<bundles_post_ra>
// kernel: tpu_custom_call.1
= control target key start
LH: loop header
LB: loop body
LE: loop exit
PB: predicated region body
PF: predicated region fallthrough
CT: control target
= control target key end

     0   :  { %s1850_s0 = inlined_call_operand.hbm [shape: f32[512,128], index: 0, kind: input, shape index: {}]   ;;  %s1851_s1 = inlined_call_operand.hbm [shape: f32[128,128], index: 1, kind: input, shape index: {}]   ;;  %s1852_s2 = inlined_call_operand.vmem [shape: f32[1,128], index: 2, kind: input, shape index: {}]   ;;  %s1853_s3 = inlined_call_operand.vmem [shape: f32[1,128], index: 3, kind: input, shape index: {}]   ;;  %s1854_s4 = inlined_call_operand.hbm [shape: f32[512,128], index: 4, kind: output, shape index: {}]  }
   0x1   :  { %1858 = sst [smem:[#allocation12_spill]] %s1851_s1 }
   0x2   :  { %9 = vsyncpa [#allocation4], 0 }
   0x3   :  { %11 = vsyncpa [#allocation4 + $0x1], 0 }
   0x4   :  { %12 = vsyncpa [#allocation7], 0 }
   0x5   :  { %13 = vsyncpa [#allocation5], 0 }
   0x6   :  { %15 = vsyncpa [#allocation5 + $0x1], 0  ;;  %s1516_s15 = smov 0   ;;  %s1518_s16 = smov 0  }
   0x7   :  { %s1520_s17 = smov 0   ;;  %s1522_s18 = smov 0  }
   0x8   :  { %s1524_s19 = smov 0   ;;  %s1526_s20 = smov 0  }
   0x9 LB: > { %s1084_s21 = sadd.s32 4294967295, %s1482_s20   ;;  %s1085_s22 = sadd.s32 4294967294, %s1482_s20   ;;  %s1482_s20 = sphi %s1526_s20, %s21_s20   ;;  %s1478_s19 = sphi %s1524_s19, %s1878_s19   ;;  %s1474_s18 = sphi %s1522_s18, %s1877_s18   ;;  %s1470_s17 = sphi %s1520_s17, %s1876_s17   ;;  %s1466_s16 = sphi %s1518_s16, %s1875_s16   ;;  %s1462_s15 = sphi %s1516_s15, %s1874_s15  }
   0xa   : > { %p62_p0 = scmp.ne.s32.totalorder %s1466_s16, %s1462_s15  ;;  %p1550_p1 = scmp.eq.s32.totalorder %s1084_s21, 0 }
   0xb   : > { %p1554_p2 = scmp.eq.s32.totalorder %s1084_s21, 1  ;;  %p174_p3 = scmp.eq.s32.totalorder %s1085_s22, 1 }
   0xc   : > { %p1560_p4 = por %p1550_p1, %p62_p0  ;;  %p1086_p5 = scmp.ge.s32.totalorder %s1482_s20, 1 }
   0xd   : > { %p1565_p6 = por %p174_p3, %p62_p0  ;;  %p181_p7 = scmp.lt.s32.totalorder %s1482_s20, 3 }
   0xe   : > { %s1861_s25 = scalar_select %p1560_p4, 1, 0 }
   0xf   : > { %s1862_s26 = scalar_select %p1565_p6, 1, 0 }
  0x10   : > { %p1570_p8 = pnand %p1086_p5, %p181_p7  ;;  %s1484_s28 = smov [#allocation6]  }
  0x11   : > { %s197_s29 = sshll.u32 %s1484_s28, 4  ;;  %s40_s5 = sadd.s32 1, %s1478_s19  ;;  %s198_s29 = int_to_ptr.vmem [resolvable:$true] %s197_s29 }
  0x12   : > { %p1275_p9 = pneg %p1570_p8  ;;  %s1355_s6 = scalar_lea.vmem %s198_s29, 2048 }
  0x13   : > { %p1356_p13 = scmp.ne.s32.totalorder %s198_s29, %s1355_s6  ;;  %p1363_p5 = scmp.lt.s32.totalorder %s198_s29, %s198_s29 }
  0x14   : > { %p1579_p11 = pnand %p1275_p9, %p1550_p1  ;;  %p1364_p7 = scmp.lt.s32.totalorder %s1355_s6, %s1355_s6 }
  0x16   : > { %p1346_p12 = pneg %p1579_p11  ;;  %p1365_p6 = por %p1364_p7, %p1363_p5 }
  0x18   : > { %p1358_p0 = pnand %p1356_p13, %p1346_p12 }
  0x1a   : > { %p1359_p3 = pneg %p1358_p0 }
  0x1c   : > { %p1366_p4 = pnand %p1365_p6, %p1359_p3 }
  0x1e   : > { %1369 = shalt.err (!%p1366_p4)
}
  0x1f   : > { %s1856_s7 = smov 128   ;;  %s1857_s8 = smov 8  }
  0x20   : > { %s1865_s1 = sld [smem:[#allocation12_spill]]  ;;  %p42_p4 = scmp.ge.s32.totalorder %s40_s5, 2 }
  0x21   : > { %s49_s11 = sadd.s32 1, %s1470_s17  ;;  %p56_p6 = scmp.ne.s32.totalorder %s1470_s17, %s1466_s16 }
  0x22   : > { %p57_p9 = scmp.eq.s32.totalorder %s1482_s20, 0  ;;  %s1880_s5 = smov (%p42_p4, %s40_s5), 0 }
  0x23   : > { %p1606_p13 = por %p1554_p2, %p56_p6  ;;  %s44_s14 = ssub.s32 %s1478_s19, %s1880_s5 }
  0x24   : > { %p1600_p12 = por %p57_p9, %p56_p6  ;;  %p1288_p0 = scmp.lt.s32.totalorder %s1482_s20, 2 }
  0x25   : > { %s223_s21 = sand.u32 1, %s1470_s17  }
  0x26   : > { %1278 = dma.hbm_to_vmem [thread:$0]  (!%p1579_p11), %s1865_s1, 2048, %s198_s29, [#allocation7], %s1856_s7, %s1856_s7, %s1857_s8  }
  0x27   : > { %p47_p11 = scmp.eq.s32.totalorder %s44_s14, 0  ;;  %s1091_s22 = sshll.u32 %s223_s21, 8 }
  0x28   : > { %s1105_s29 = sshll.u32 %s1478_s19, 12  ;;  %s227_s10 = scalar_lea.vmem [#allocation3], %s1091_s22 }
  0x29   : > { %s1615_s28 = scalar_select %p47_p11, %s1470_s17, %s49_s11  }
  0x2a   : > { %s234_s9 = scalar_lea.hbm %s1850_s0, %s1105_s29  ;;  %s235_s7 = sshll.u32 %s227_s10, 4  ;;  %s236_s7 = int_to_ptr.vmem [resolvable:$true] %s235_s7 }
  0x2b   : > { %p1623_p2 = pnand %p1288_p0, %p1600_p12  ;;  %s224_s8 = scalar_lea.sflag [#allocation4], %s223_s21 }
  0x2c   : > { %s1383_s14 = scalar_lea.vmem %s236_s7, 4096  ;;  %s1487_s11 = smov [#allocation3]  }
  0x2d   : > { %p1372_p3 = pneg %p1623_p2  ;;  %p1384_p5 = scmp.ne.s32.totalorder %s236_s7, %s1383_s14 }
  0x2e   : > { %s1388_s1 = sshll.u32 %s1487_s11, 4  ;;  %s1389_s1 = int_to_ptr.vmem [resolvable:$false] %s1388_s1 }
  0x2f   : > { %p1386_p7 = pnand %p1384_p5, %p1372_p3  ;;  %s1390_s29 = scalar_lea.vmem %s1389_s1, 8192 }
  0x30   : > { %p1391_p6 = scmp.lt.s32.totalorder %s236_s7, %s1389_s1  ;;  %p1392_p9 = scmp.lt.s32.totalorder %s1390_s29, %s1383_s14 }
  0x31   : > { %p1387_p4 = pneg %p1386_p7 }
  0x32   : > { %p1393_p11 = por %p1392_p9, %p1391_p6 }
  0x34   : > { %p1394_p10 = pnand %p1393_p11, %p1387_p4 }
  0x36   : > { %1397 = shalt.err (!%p1394_p10)
}
  0x37   : > { %s1869_s12 = smov 8   ;;  %s1870_s22 = smov 128  }
  0x38   : > { %1282 = dma.hbm_to_vmem [thread:$0]  (!%p1623_p2), %s234_s9, 4096, %s236_s7, %s224_s8, %s1870_s22, %s1870_s22, %s1869_s12  }
  0x39   : > { %247 = sbr.rel (%p1570_p8) target bundleno = 350 (0x15e), region = 36  ;;  %s1637_s21 = sand.u32 (!%p1570_p8), 1, %s1466_s16  }
  0x3a   : > { %s1095_s1 = sshll.u32 (!%p1570_p8), %s1637_s21, 8  ;;  %s250_s30 = scalar_lea.sflag (!%p1570_p8), [#allocation4], %s1637_s21 }
  0x3b   : > { %s1643_s6 = scalar_lea.vmem (!%p1570_p8), [#allocation3], %s1095_s1  ;;  %p1871_p10 = scmp.ne.s32.totalorder (!%p1570_p8), %s1861_s25, 0 }
  0x3e   : > { %1449 = dma.done.wait (%p1871_p10), %s250_s30, 4096  }
  0x3f   : > { %1451 = vsyncadd (%p1871_p10), %s250_s30, 4294963200 }
  0x40   : > { %1453 = dma.done.wait (%p1550_p1), [#allocation7], 2048  }
  0x41   : > { %1455 = vsyncadd (%p1550_p1), [#allocation7], 4294965248  ;;  %v412_v0 = vld [vmem:[#allocation6 + $0x78] sm:$0xff]  ;;  %v411_v1 = vld [vmem:[#allocation6 + $0x70] sm:$0xff]  ;;  %s1709_s8 = scalar_lea.vmem [#allocation8], %s1095_s1  ;;  %s1106_s9 = sshll.u32 %s1474_s18, 12 }
  0x42   : > { %1155 = vmatprep.subr.mxu0 %v412_v0  ;;  %1235 = vmatprep.subr.mxu1 %v412_v0  ;;  %v410_v2 = vld [vmem:[#allocation6 + $0x68] sm:$0xff]  ;;  %v409_v3 = vld [vmem:[#allocation6 + $0x60] sm:$0xff]  ;;  %v408_v4 = vld [vmem:[#allocation6 + $0x58] sm:$0xff]  ;;  %s958_s10 = sshll.u32 %s1709_s8, 4  ;;  %s1796_s14 = scalar_lea.hbm %s1854_s4, %s1106_s9  ;;  %s1798_s10 = int_to_ptr.vmem [resolvable:$true] %s958_s10 }
  0x43   : > { %1156 = vmatpush3.msra.mxu0 %v412_v0  ;;  %1251 = vmatpush3.msra.mxu1 %v412_v0  ;;  %v407_v5 = vld [vmem:[#allocation6 + $0x50] sm:$0xff]  ;;  %v406_v6 = vld [vmem:[#allocation6 + $0x48] sm:$0xff]  ;;  %v405_v7 = vld [vmem:[#allocation6 + $0x40] sm:$0xff]  ;;  %s944_s11 = scalar_lea.sflag [#allocation5], %s1637_s21  ;;  %s1398_s29 = scalar_lea.vmem %s1798_s10, 4096 }
  0x44   : > { %1157 = vmatprep.subr.mxu0 %v411_v1  ;;  %1236 = vmatprep.subr.mxu1 %v411_v1  ;;  %v404_v8 = vld [vmem:[#allocation6 + $0x38] sm:$0xff]  ;;  %v403_v9 = vld [vmem:[#allocation6 + $0x30] sm:$0xff]  ;;  %v402_v10 = vld [vmem:[#allocation6 + $0x28] sm:$0xff]  ;;  %p1399_p1 = scmp.ne.s32.totalorder %s1798_s10, %s1398_s29  ;;  %s1488_s12 = smov [#allocation8]  }
  0x45   : > { %1158 = vmatpush3.msra.mxu0 %v411_v1  ;;  %1252 = vmatpush3.msra.mxu1 %v411_v1  ;;  %v401_v11 = vld [vmem:[#allocation6 + $0x20] sm:$0xff]  ;;  %v400_v12 = vld [vmem:[#allocation6 + $0x18] sm:$0xff]  ;;  %v399_v13 = vld [vmem:[#allocation6 + $0x10] sm:$0xff]  ;;  %s1402_s22 = sshll.u32 %s1488_s12, 4  ;;  %s1403_s22 = int_to_ptr.vmem [resolvable:$false] %s1402_s22 }
  0x46   : > { %1159 = vmatprep.subr.mxu0 %v410_v2  ;;  %1237 = vmatprep.subr.mxu1 %v410_v2  ;;  %v398_v14 = vld [vmem:[#allocation6 + $0x8] sm:$0xff]  ;;  %v397_v15 = vld [vmem:[#allocation6] sm:$0xff]  ;;  %v367_v20 = vld [vmem:[%s1643_s6 + $0x10] sm:$0xff]  ;;  %p1400_p8 = pnand %p1399_p1, %p1606_p13  ;;  %s1404_s1 = scalar_lea.vmem %s1403_s22, 8192 }
  0x47   : > { %1160 = vmatpush3.msra.mxu0 %v410_v2  ;;  %1253 = vmatpush3.msra.mxu1 %v410_v2  ;;  %v365_v16 = vld [vmem:[%s1643_s6] sm:$0xff]  ;;  %v366_v18 = vld [vmem:[%s1643_s6 + $0x8] sm:$0xff]  ;;  %v383_v21 = vld [vmem:[%s1643_s6 + $0x90] sm:$0xff]  ;;  %p1405_p0 = scmp.lt.s32.totalorder %s1798_s10, %s1403_s22  ;;  %p1406_p2 = scmp.lt.s32.totalorder %s1404_s1, %s1398_s29 }
  0x48   : > { %1161 = vmatprep.subr.mxu0 %v409_v3  ;;  %1238 = vmatprep.subr.mxu1 %v409_v3  ;;  %v381_v17 = vld [vmem:[%s1643_s6 + $0x80] sm:$0xff]  ;;  %v382_v19 = vld [vmem:[%s1643_s6 + $0x88] sm:$0xff]  ;;  %v368_v22 = vld [vmem:[%s1643_s6 + $0x18] sm:$0xff]  ;;  %p1401_p12 = pneg %p1400_p8 }
  0x49   : > { %1162 = vmatpush3.msra.mxu0 %v409_v3  ;;  %1254 = vmatpush3.msra.mxu1 %v409_v3  ;;  %v384_v23 = vld [vmem:[%s1643_s6 + $0x98] sm:$0xff]  ;;  %v369_v24 = vld [vmem:[%s1643_s6 + $0x20] sm:$0xff]  ;;  %v370_v26 = vld [vmem:[%s1643_s6 + $0x28] sm:$0xff]  ;;  %p1407_p3 = por %p1406_p2, %p1405_p0 }
  0x4a   : > { %1163 = vmatprep.subr.mxu0 %v408_v4  ;;  %1239 = vmatprep.subr.mxu1 %v408_v4  ;;  %v385_v25 = vld [vmem:[%s1643_s6 + $0xa0] sm:$0xff]  ;;  %v386_v27 = vld [vmem:[%s1643_s6 + $0xa8] sm:$0xff]  ;;  %v371_v28 = vld [vmem:[%s1643_s6 + $0x30] sm:$0xff] }
  0x4b   : > { %1164 = vmatpush3.msra.mxu0 %v408_v4  ;;  %1255 = vmatpush3.msra.mxu1 %v408_v4  ;;  %v387_v29 = vld [vmem:[%s1643_s6 + $0xb0] sm:$0xff]  ;;  %v372_v30 = vld [vmem:[%s1643_s6 + $0x38] sm:$0xff]  ;;  %v373_v32 = vld [vmem:[%s1643_s6 + $0x40] sm:$0xff]  ;;  %p1408_p5 = pnand %p1407_p3, %p1401_p12 }
  0x4c   : > { %1165 = vmatprep.subr.mxu0 %v407_v5  ;;  %1240 = vmatprep.subr.mxu1 %v407_v5  ;;  %v388_v31 = vld [vmem:[%s1643_s6 + $0xb8] sm:$0xff]  ;;  %v389_v33 = vld [vmem:[%s1643_s6 + $0xc0] sm:$0xff]  ;;  %v374_v34 = vld [vmem:[%s1643_s6 + $0x48] sm:$0xff] }
  0x4d   : > { %1166 = vmatpush3.msra.mxu0 %v407_v5  ;;  %1256 = vmatpush3.msra.mxu1 %v407_v5  ;;  %v390_v35 = vld [vmem:[%s1643_s6 + $0xc8] sm:$0xff]  ;;  %v375_v36 = vld [vmem:[%s1643_s6 + $0x50] sm:$0xff]  ;;  %v376_v38 = vld [vmem:[%s1643_s6 + $0x58] sm:$0xff] }
  0x4e   : > { %1167 = vmatprep.subr.mxu0 %v406_v6  ;;  %1241 = vmatprep.subr.mxu1 %v406_v6  ;;  %v391_v37 = vld [vmem:[%s1643_s6 + $0xd0] sm:$0xff]  ;;  %v392_v39 = vld [vmem:[%s1643_s6 + $0xd8] sm:$0xff]  ;;  %v377_v40 = vld [vmem:[%s1643_s6 + $0x60] sm:$0xff] }
  0x4f   : > { %1168 = vmatpush3.msra.mxu0 %v406_v6  ;;  %1257 = vmatpush3.msra.mxu1 %v406_v6  ;;  %v393_v41 = vld [vmem:[%s1643_s6 + $0xe0] sm:$0xff]  ;;  %v378_v42 = vld [vmem:[%s1643_s6 + $0x68] sm:$0xff]  ;;  %v379_v44 = vld [vmem:[%s1643_s6 + $0x70] sm:$0xff] }
  0x50   : > { %1169 = vmatprep.subr.mxu0 %v405_v7  ;;  %1242 = vmatprep.subr.mxu1 %v405_v7  ;;  %v394_v43 = vld [vmem:[%s1643_s6 + $0xe8] sm:$0xff]  ;;  %v395_v45 = vld [vmem:[%s1643_s6 + $0xf0] sm:$0xff]  ;;  %v380_v46 = vld [vmem:[%s1643_s6 + $0x78] sm:$0xff] }
  0x51   : > { %1170 = vmatpush3.msra.mxu0 %v405_v7  ;;  %1258 = vmatpush3.msra.mxu1 %v405_v7  ;;  %v396_v47 = vld [vmem:[%s1643_s6 + $0xf8] sm:$0xff]  ;;  %v1688_v48 = vld [vmem:[%s1852_s2] ss:$0 sm:$0xff] }
  0x52   : > { %1171 = vmatprep.subr.mxu0 %v404_v8  ;;  %1243 = vmatprep.subr.mxu1 %v404_v8  ;;  %v1693_v50 = vld [vmem:[%s1853_s3] ss:$0 sm:$0xff] }
  0x53   : > { %1172 = vmatpush3.msra.mxu0 %v404_v8  ;;  %1259 = vmatpush3.msra.mxu1 %v404_v8 }
  0x54   : > { %1173 = vmatprep.subr.mxu0 %v403_v9  ;;  %1244 = vmatprep.subr.mxu1 %v403_v9 }
  0x55   : > { %1174 = vmatpush3.msra.mxu0 %v403_v9  ;;  %1260 = vmatpush3.msra.mxu1 %v403_v9 }
  0x56   : > { %1175 = vmatprep.subr.mxu0 %v402_v10  ;;  %1245 = vmatprep.subr.mxu1 %v402_v10 }
  0x57   : > { %1176 = vmatpush3.msra.mxu0 %v402_v10  ;;  %1261 = vmatpush3.msra.mxu1 %v402_v10 }
  0x58   : > { %1177 = vmatprep.subr.mxu0 %v401_v11  ;;  %1246 = vmatprep.subr.mxu1 %v401_v11 }
  0x59   : > { %1178 = vmatpush3.msra.mxu0 %v401_v11  ;;  %1262 = vmatpush3.msra.mxu1 %v401_v11 }
  0x5a   : > { %1179 = vmatprep.subr.mxu0 %v400_v12  ;;  %1247 = vmatprep.subr.mxu1 %v400_v12 }
  0x5b   : > { %1180 = vmatpush3.msra.mxu0 %v400_v12  ;;  %1263 = vmatpush3.msra.mxu1 %v400_v12 }
  0x5c   : > { %1181 = vmatprep.subr.mxu0 %v399_v13  ;;  %1248 = vmatprep.subr.mxu1 %v399_v13 }
  0x5d   : > { %1182 = vmatpush3.msra.mxu0 %v399_v13  ;;  %1264 = vmatpush3.msra.mxu1 %v399_v13 }
  0x5e   : > { %1183 = vmatprep.subr.mxu0 %v398_v14  ;;  %1249 = vmatprep.subr.mxu1 %v398_v14 }
  0x5f   : > { %1184 = vmatpush3.msra.mxu0 %v398_v14  ;;  %1265 = vmatpush3.msra.mxu1 %v398_v14 }
  0x60   : > { %1185 = vmatprep.subr.mxu0 %v397_v15  ;;  %1250 = vmatprep.subr.mxu1 %v397_v15 }
  0x61   : > { %1186 = vmatpush3.msra.mxu0 %v397_v15  ;;  %1266 = vmatpush3.msra.mxu1 %v397_v15 }
  0x62   : > { %1187 = vmatprep.mubr.f32.mxu0 %v365_v16  ;;  %1211 = vmatprep.mubr.f32.mxu1 %v381_v17 }
  0x63   : > { %1188 = vmatmul.mubr.f32.vlgmr.msra.gmra.mxu0 %v366_v18  ;;  %1212 = vmatmul.mubr.f32.vlgmr.msra.gmra.mxu1 %v382_v19 }
  0x64   : > { %1190 = vmatprep.mubr.f32.mxu0 %v367_v20  ;;  %1214 = vmatprep.mubr.f32.mxu1 %v383_v21 }
  0x67   : > { %1191 = vmatmul.mubr.f32.gmra.mxu0 %v368_v22  ;;  %1215 = vmatmul.mubr.f32.gmra.mxu1 %v384_v23 }
  0x68   : > { %1193 = vmatprep.mubr.f32.mxu0 %v369_v24  ;;  %1217 = vmatprep.mubr.f32.mxu1 %v385_v25 }
  0x6b   : > { %1194 = vmatmul.mubr.f32.gmra.mxu0 %v370_v26  ;;  %1218 = vmatmul.mubr.f32.gmra.mxu1 %v386_v27 }
  0x6c   : > { %1196 = vmatprep.mubr.f32.mxu0 %v371_v28  ;;  %1220 = vmatprep.mubr.f32.mxu1 %v387_v29 }
  0x6f   : > { %1197 = vmatmul.mubr.f32.gmra.mxu0 %v372_v30  ;;  %1221 = vmatmul.mubr.f32.gmra.mxu1 %v388_v31 }
  0x70   : > { %1199 = vmatprep.mubr.f32.mxu0 %v373_v32  ;;  %1223 = vmatprep.mubr.f32.mxu1 %v389_v33 }
  0x73   : > { %1200 = vmatmul.mubr.f32.gmra.mxu0 %v374_v34  ;;  %1224 = vmatmul.mubr.f32.gmra.mxu1 %v390_v35 }
  0x74   : > { %1202 = vmatprep.mubr.f32.mxu0 %v375_v36  ;;  %1226 = vmatprep.mubr.f32.mxu1 %v391_v37 }
  0x77   : > { %1203 = vmatmul.mubr.f32.gmra.mxu0 %v376_v38  ;;  %1227 = vmatmul.mubr.f32.gmra.mxu1 %v392_v39 }
  0x78   : > { %1205 = vmatprep.mubr.f32.mxu0 %v377_v40  ;;  %1229 = vmatprep.mubr.f32.mxu1 %v393_v41 }
  0x7b   : > { %1206 = vmatmul.mubr.f32.gmra.mxu0 %v378_v42  ;;  %1230 = vmatmul.mubr.f32.gmra.mxu1 %v394_v43 }
  0x7c   : > { %1208 = vmatprep.mubr.f32.mxu0 %v379_v44  ;;  %1232 = vmatprep.mubr.f32.mxu1 %v395_v45 }
  0x7f   : > { %1209 = vmatmul.mubr.f32.gmra.mxu0 %v380_v46  ;;  %1233 = vmatmul.mubr.f32.gmra.mxu1 %v396_v47 }
 0x123   : > { %v1189_v49 = vpop.f32.mrf.mxu0  ;;  %v1213_v51 = vpop.f32.mrf.mxu1 }
 0x124   : > { %v745_v52 = vmul.f32 %v1189_v49, %v1688_v48  ;;  %v761_v53 = vmul.f32 %v1213_v51, %v1688_v48 }
 0x125   : > { %v479_v54 = vpop.f32.mrf.mxu0  ;;  %v559_v55 = vpop.f32.mrf.mxu1 }
 0x126   : > { %v784_v56 = vadd.f32 %v1693_v50, %v745_v52  ;;  %v800_v57 = vadd.f32 %v1693_v50, %v761_v53  ;;  %v744_v58 = vmul.f32 %v1688_v48, %v479_v54  ;;  %v760_v59 = vmul.f32 %v1688_v48, %v559_v55 }
 0x127   : > { %v1192_v60 = vpop.f32.mrf.mxu0  ;;  %v1216_v61 = vpop.f32.mrf.mxu1 }
 0x128   : > { %vm816_vm0 = vcmp.ge.f32.partialorder %v784_v56, 0.0  ;;  %v848_v62 = vmul.f32 0.1, %v784_v56  ;;  %vm832_vm1 = vcmp.ge.f32.partialorder %v800_v57, 0.0  ;;  %v864_v63 = vmul.f32 0.1, %v800_v57 }
 0x129   : > { %v783_v0 = vadd.f32 %v1693_v50, %v744_v58  ;;  %v799_v1 = vadd.f32 %v1693_v50, %v760_v59  ;;  %v747_v2 = vmul.f32 %v1192_v60, %v1688_v48  ;;  %v763_v3 = vmul.f32 %v1216_v61, %v1688_v48  ;;  %v489_v4 = vpop.f32.mrf.mxu0  ;;  %v569_v5 = vpop.f32.mrf.mxu1 }
 0x12a   : > { %v880_v6 = vsel %vm816_vm0, %v784_v56, %v848_v62  ;;  %v896_v7 = vsel %vm832_vm1, %v800_v57, %v864_v63  ;;  %v746_v8 = vmul.f32 %v1688_v48, %v489_v4  ;;  %v762_v9 = vmul.f32 %v1688_v48, %v569_v5 }
 0x12b   : > { %912 = vst [vmem:[%s1709_s8 + $0x8] sm:$0xff] %v880_v6  ;;  %928 = vst [vmem:[%s1709_s8 + $0x88] sm:$0xff] %v896_v7  ;;  %vm815_vm2 = vcmp.ge.f32.partialorder %v783_v0, 0.0  ;;  %v847_v10 = vmul.f32 0.1, %v783_v0  ;;  %vm831_vm3 = vcmp.ge.f32.partialorder %v799_v1, 0.0  ;;  %v1195_v12 = vpop.f32.mrf.mxu0  ;;  %v1219_v13 = vpop.f32.mrf.mxu1  ;;  %v786_v14 = vadd.f32 %v1693_v50, %v747_v2 }
 0x12c   : > { %v863_v11 = vmul.f32 0.1, %v799_v1  ;;  %v802_v15 = vadd.f32 %v1693_v50, %v763_v3  ;;  %v785_v16 = vadd.f32 %v1693_v50, %v746_v8  ;;  %v801_v17 = vadd.f32 %v1693_v50, %v762_v9 }
 0x12d   : > { %v879_v18 = vsel %vm815_vm2, %v783_v0, %v847_v10  ;;  %v749_v20 = vmul.f32 %v1195_v12, %v1688_v48  ;;  %v765_v21 = vmul.f32 %v1219_v13, %v1688_v48  ;;  %v499_v22 = vpop.f32.mrf.mxu0  ;;  %v579_v23 = vpop.f32.mrf.mxu1  ;;  %vm818_vm4 = vcmp.ge.f32.partialorder %v786_v14, 0.0 }
 0x12e   : > { %v895_v19 = vsel %vm831_vm3, %v799_v1, %v863_v11  ;;  %911 = vst [vmem:[%s1709_s8] sm:$0xff] %v879_v18  ;;  %v850_v24 = vmul.f32 0.1, %v786_v14  ;;  %vm834_vm5 = vcmp.ge.f32.partialorder %v802_v15, 0.0  ;;  %v866_v25 = vmul.f32 0.1, %v802_v15 }
 0x12f   : > { %927 = vst [vmem:[%s1709_s8 + $0x80] sm:$0xff] %v895_v19  ;;  %vm817_vm6 = vcmp.ge.f32.partialorder %v785_v16, 0.0  ;;  %v849_v26 = vmul.f32 0.1, %v785_v16  ;;  %vm833_vm7 = vcmp.ge.f32.partialorder %v801_v17, 0.0  ;;  %v1198_v28 = vpop.f32.mrf.mxu0  ;;  %v1222_v29 = vpop.f32.mrf.mxu1  ;;  %v788_v32 = vadd.f32 %v1693_v50, %v749_v20 }
 0x130   : > { %v865_v27 = vmul.f32 0.1, %v801_v17  ;;  %v882_v30 = vsel %vm818_vm4, %v786_v14, %v850_v24  ;;  %v898_v31 = vsel %vm834_vm5, %v802_v15, %v866_v25  ;;  %v804_v33 = vadd.f32 %v1693_v50, %v765_v21 }
 0x131   : > { %914 = vst [vmem:[%s1709_s8 + $0x18] sm:$0xff] %v882_v30  ;;  %930 = vst [vmem:[%s1709_s8 + $0x98] sm:$0xff] %v898_v31  ;;  %v881_v34 = vsel %vm817_vm6, %v785_v16, %v849_v26  ;;  %v748_v36 = vmul.f32 %v1688_v48, %v499_v22  ;;  %v764_v37 = vmul.f32 %v1688_v48, %v579_v23  ;;  %v509_v38 = vpop.f32.mrf.mxu0  ;;  %v589_v39 = vpop.f32.mrf.mxu1  ;;  %vm820_vm8 = vcmp.ge.f32.partialorder %v788_v32, 0.0 }
 0x132   : > { %v897_v35 = vsel %vm833_vm7, %v801_v17, %v865_v27  ;;  %913 = vst [vmem:[%s1709_s8 + $0x10] sm:$0xff] %v881_v34  ;;  %v852_v40 = vmul.f32 0.1, %v788_v32  ;;  %vm836_vm9 = vcmp.ge.f32.partialorder %v804_v33, 0.0  ;;  %v868_v41 = vmul.f32 0.1, %v804_v33 }
 0x133   : > { %929 = vst [vmem:[%s1709_s8 + $0x90] sm:$0xff] %v897_v35  ;;  %v787_v42 = vadd.f32 %v1693_v50, %v748_v36  ;;  %v803_v43 = vadd.f32 %v1693_v50, %v764_v37  ;;  %v751_v44 = vmul.f32 %v1198_v28, %v1688_v48  ;;  %v767_v45 = vmul.f32 %v1222_v29, %v1688_v48  ;;  %v1201_v46 = vpop.f32.mrf.mxu0  ;;  %v1225_v47 = vpop.f32.mrf.mxu1 }
 0x134   : > { %v884_v49 = vsel %vm820_vm8, %v788_v32, %v852_v40  ;;  %v900_v51 = vsel %vm836_vm9, %v804_v33, %v868_v41  ;;  %v750_v52 = vmul.f32 %v1688_v48, %v509_v38  ;;  %v766_v53 = vmul.f32 %v1688_v48, %v589_v39 }
 0x135   : > { %916 = vst [vmem:[%s1709_s8 + $0x28] sm:$0xff] %v884_v49  ;;  %932 = vst [vmem:[%s1709_s8 + $0xa8] sm:$0xff] %v900_v51  ;;  %vm819_vm10 = vcmp.ge.f32.partialorder %v787_v42, 0.0  ;;  %v851_v54 = vmul.f32 0.1, %v787_v42  ;;  %vm835_vm11 = vcmp.ge.f32.partialorder %v803_v43, 0.0  ;;  %v519_v56 = vpop.f32.mrf.mxu0  ;;  %v599_v57 = vpop.f32.mrf.mxu1  ;;  %v790_v58 = vadd.f32 %v1693_v50, %v751_v44 }
 0x136   : > { %v867_v55 = vmul.f32 0.1, %v803_v43  ;;  %v806_v59 = vadd.f32 %v1693_v50, %v767_v45  ;;  %v789_v60 = vadd.f32 %v1693_v50, %v750_v52  ;;  %v805_v61 = vadd.f32 %v1693_v50, %v766_v53 }
 0x137   : > { %v883_v62 = vsel %vm819_vm10, %v787_v42, %v851_v54  ;;  %v753_v0 = vmul.f32 %v1201_v46, %v1688_v48  ;;  %v769_v1 = vmul.f32 %v1225_v47, %v1688_v48  ;;  %v1204_v2 = vpop.f32.mrf.mxu0  ;;  %v1228_v3 = vpop.f32.mrf.mxu1  ;;  %vm822_vm12 = vcmp.ge.f32.partialorder %v790_v58, 0.0 }
 0x138   : > { %v899_v63 = vsel %vm835_vm11, %v803_v43, %v867_v55  ;;  %915 = vst [vmem:[%s1709_s8 + $0x20] sm:$0xff] %v883_v62  ;;  %v854_v4 = vmul.f32 0.1, %v790_v58  ;;  %vm838_vm13 = vcmp.ge.f32.partialorder %v806_v59, 0.0  ;;  %v870_v5 = vmul.f32 0.1, %v806_v59 }
 0x139   : > { %931 = vst [vmem:[%s1709_s8 + $0xa0] sm:$0xff] %v899_v63  ;;  %vm821_vm14 = vcmp.ge.f32.partialorder %v789_v60, 0.0  ;;  %v853_v6 = vmul.f32 0.1, %v789_v60  ;;  %vm837_vm15 = vcmp.ge.f32.partialorder %v805_v61, 0.0  ;;  %v529_v8 = vpop.f32.mrf.mxu0  ;;  %v609_v9 = vpop.f32.mrf.mxu1  ;;  %v792_v12 = vadd.f32 %v1693_v50, %v753_v0 }
 0x13a   : > { %v869_v7 = vmul.f32 0.1, %v805_v61  ;;  %v886_v10 = vsel %vm822_vm12, %v790_v58, %v854_v4  ;;  %v902_v11 = vsel %vm838_vm13, %v806_v59, %v870_v5  ;;  %v808_v13 = vadd.f32 %v1693_v50, %v769_v1 }
 0x13b   : > { %918 = vst [vmem:[%s1709_s8 + $0x38] sm:$0xff] %v886_v10  ;;  %934 = vst [vmem:[%s1709_s8 + $0xb8] sm:$0xff] %v902_v11  ;;  %v885_v14 = vsel %vm821_vm14, %v789_v60, %v853_v6  ;;  %v752_v16 = vmul.f32 %v1688_v48, %v519_v56  ;;  %v768_v17 = vmul.f32 %v1688_v48, %v599_v57  ;;  %v1207_v18 = vpop.f32.mrf.mxu0  ;;  %v1231_v19 = vpop.f32.mrf.mxu1  ;;  %vm824_vm0 = vcmp.ge.f32.partialorder %v792_v12, 0.0 }
 0x13c   : > { %v901_v15 = vsel %vm837_vm15, %v805_v61, %v869_v7  ;;  %917 = vst [vmem:[%s1709_s8 + $0x30] sm:$0xff] %v885_v14  ;;  %v856_v20 = vmul.f32 0.1, %v792_v12  ;;  %vm840_vm1 = vcmp.ge.f32.partialorder %v808_v13, 0.0  ;;  %v872_v21 = vmul.f32 0.1, %v808_v13 }
 0x13d   : > { %933 = vst [vmem:[%s1709_s8 + $0xb0] sm:$0xff] %v901_v15  ;;  %v791_v22 = vadd.f32 %v1693_v50, %v752_v16  ;;  %v807_v23 = vadd.f32 %v1693_v50, %v768_v17  ;;  %v755_v24 = vmul.f32 %v1204_v2, %v1688_v48  ;;  %v771_v25 = vmul.f32 %v1228_v3, %v1688_v48  ;;  %v539_v26 = vpop.f32.mrf.mxu0  ;;  %v619_v27 = vpop.f32.mrf.mxu1 }
 0x13e   : > { %v888_v28 = vsel %vm824_vm0, %v792_v12, %v856_v20  ;;  %v904_v29 = vsel %vm840_vm1, %v808_v13, %v872_v21  ;;  %v754_v30 = vmul.f32 %v1688_v48, %v529_v8  ;;  %v770_v31 = vmul.f32 %v1688_v48, %v609_v9 }
 0x13f   : > { %920 = vst [vmem:[%s1709_s8 + $0x48] sm:$0xff] %v888_v28  ;;  %936 = vst [vmem:[%s1709_s8 + $0xc8] sm:$0xff] %v904_v29  ;;  %vm823_vm2 = vcmp.ge.f32.partialorder %v791_v22, 0.0  ;;  %v855_v32 = vmul.f32 0.1, %v791_v22  ;;  %vm839_vm3 = vcmp.ge.f32.partialorder %v807_v23, 0.0  ;;  %v794_v34 = vadd.f32 %v1693_v50, %v755_v24  ;;  %v1210_v42 = vpop.f32.mrf.mxu0  ;;  %v1234_v43 = vpop.f32.mrf.mxu1 }
 0x140   : > { %v871_v33 = vmul.f32 0.1, %v807_v23  ;;  %v810_v35 = vadd.f32 %v1693_v50, %v771_v25  ;;  %v793_v36 = vadd.f32 %v1693_v50, %v754_v30  ;;  %v809_v37 = vadd.f32 %v1693_v50, %v770_v31 }
 0x141   : > { %v887_v38 = vsel %vm823_vm2, %v791_v22, %v855_v32  ;;  %v757_v40 = vmul.f32 %v1207_v18, %v1688_v48  ;;  %v773_v41 = vmul.f32 %v1231_v19, %v1688_v48  ;;  %vm826_vm4 = vcmp.ge.f32.partialorder %v794_v34, 0.0  ;;  %v549_v58 = vpop.f32.mrf.mxu0  ;;  %v629_v59 = vpop.f32.mrf.mxu1 }
 0x142   : > { %v903_v39 = vsel %vm839_vm3, %v807_v23, %v871_v33  ;;  %919 = vst [vmem:[%s1709_s8 + $0x40] sm:$0xff] %v887_v38  ;;  %v858_v44 = vmul.f32 0.1, %v794_v34  ;;  %vm842_vm5 = vcmp.ge.f32.partialorder %v810_v35, 0.0  ;;  %v874_v45 = vmul.f32 0.1, %v810_v35 }
 0x143   : > { %935 = vst [vmem:[%s1709_s8 + $0xc0] sm:$0xff] %v903_v39  ;;  %vm825_vm6 = vcmp.ge.f32.partialorder %v793_v36, 0.0  ;;  %v857_v46 = vmul.f32 0.1, %v793_v36  ;;  %vm841_vm7 = vcmp.ge.f32.partialorder %v809_v37, 0.0  ;;  %v796_v52 = vadd.f32 %v1693_v50, %v757_v40 }
 0x144   : > { %v873_v47 = vmul.f32 0.1, %v809_v37  ;;  %v890_v49 = vsel %vm826_vm4, %v794_v34, %v858_v44  ;;  %v906_v51 = vsel %vm842_vm5, %v810_v35, %v874_v45  ;;  %v812_v53 = vadd.f32 %v1693_v50, %v773_v41 }
 0x145   : > { %922 = vst [vmem:[%s1709_s8 + $0x58] sm:$0xff] %v890_v49  ;;  %938 = vst [vmem:[%s1709_s8 + $0xd8] sm:$0xff] %v906_v51  ;;  %v889_v54 = vsel %vm825_vm6, %v793_v36, %v857_v46  ;;  %v756_v56 = vmul.f32 %v1688_v48, %v539_v26  ;;  %v772_v57 = vmul.f32 %v1688_v48, %v619_v27  ;;  %vm828_vm8 = vcmp.ge.f32.partialorder %v796_v52, 0.0 }
 0x146   : > { %v905_v55 = vsel %vm841_vm7, %v809_v37, %v873_v47  ;;  %921 = vst [vmem:[%s1709_s8 + $0x50] sm:$0xff] %v889_v54  ;;  %v860_v60 = vmul.f32 0.1, %v796_v52  ;;  %vm844_vm9 = vcmp.ge.f32.partialorder %v812_v53, 0.0  ;;  %v876_v61 = vmul.f32 0.1, %v812_v53 }
 0x147   : > { %937 = vst [vmem:[%s1709_s8 + $0xd0] sm:$0xff] %v905_v55  ;;  %v795_v62 = vadd.f32 %v1693_v50, %v756_v56  ;;  %v811_v63 = vadd.f32 %v1693_v50, %v772_v57  ;;  %v759_v0 = vmul.f32 %v1210_v42, %v1688_v48  ;;  %v775_v1 = vmul.f32 %v1234_v43, %v1688_v48 }
 0x148   : > { %v892_v2 = vsel %vm828_vm8, %v796_v52, %v860_v60  ;;  %v908_v3 = vsel %vm844_vm9, %v812_v53, %v876_v61  ;;  %v758_v4 = vmul.f32 %v1688_v48, %v549_v58  ;;  %v774_v5 = vmul.f32 %v1688_v48, %v629_v59 }
 0x149   : > { %924 = vst [vmem:[%s1709_s8 + $0x68] sm:$0xff] %v892_v2  ;;  %940 = vst [vmem:[%s1709_s8 + $0xe8] sm:$0xff] %v908_v3  ;;  %vm827_vm10 = vcmp.ge.f32.partialorder %v795_v62, 0.0  ;;  %v859_v6 = vmul.f32 0.1, %v795_v62  ;;  %vm843_vm11 = vcmp.ge.f32.partialorder %v811_v63, 0.0  ;;  %v798_v8 = vadd.f32 %v1693_v50, %v759_v0 }
 0x14a   : > { %v875_v7 = vmul.f32 0.1, %v811_v63  ;;  %v814_v9 = vadd.f32 %v1693_v50, %v775_v1  ;;  %v797_v10 = vadd.f32 %v1693_v50, %v758_v4  ;;  %v813_v11 = vadd.f32 %v1693_v50, %v774_v5 }
 0x14b   : > { %v891_v12 = vsel %vm827_vm10, %v795_v62, %v859_v6  ;;  %vm830_vm12 = vcmp.ge.f32.partialorder %v798_v8, 0.0  ;;  %v862_v13 = vmul.f32 0.1, %v798_v8 }
 0x14c   : > { %v907_v48 = vsel %vm843_vm11, %v811_v63, %v875_v7  ;;  %923 = vst [vmem:[%s1709_s8 + $0x60] sm:$0xff] %v891_v12  ;;  %vm846_vm13 = vcmp.ge.f32.partialorder %v814_v9, 0.0  ;;  %v878_v14 = vmul.f32 0.1, %v814_v9  ;;  %vm829_vm14 = vcmp.ge.f32.partialorder %v797_v10, 0.0 }
 0x14d   : > { %939 = vst [vmem:[%s1709_s8 + $0xe0] sm:$0xff] %v907_v48  ;;  %v861_v15 = vmul.f32 0.1, %v797_v10  ;;  %vm845_vm15 = vcmp.ge.f32.partialorder %v813_v11, 0.0  ;;  %v877_v50 = vmul.f32 0.1, %v813_v11  ;;  %v894_v16 = vsel %vm830_vm12, %v798_v8, %v862_v13 }
 0x14e   : > { %v910_v17 = vsel %vm846_vm13, %v814_v9, %v878_v14  ;;  %926 = vst [vmem:[%s1709_s8 + $0x78] sm:$0xff] %v894_v16 }
 0x14f   : > { %942 = vst [vmem:[%s1709_s8 + $0xf8] sm:$0xff] %v910_v17  ;;  %v893_v18 = vsel %vm829_vm14, %v797_v10, %v861_v15  ;;  %v909_v19 = vsel %vm845_vm15, %v813_v11, %v877_v50 }
 0x150   : > { %925 = vst [vmem:[%s1709_s8 + $0x70] sm:$0xff] %v893_v18  ;;  %941 = vst [vmem:[%s1709_s8 + $0xf0] sm:$0xff] %v909_v19 }
 0x151   : > { %1411 = shalt.err (!%p1408_p5)
}
 0x152   : > { %s1412_s30 = scalar_lea.hbm %s1796_s14, 4096  ;;  %s1416_s25 = scalar_lea.hbm %s1854_s4, 8192 }
 0x153   : > { %p1413_p7 = scmp.ne.s32.totalorder %s1796_s14, %s1412_s30  ;;  %p1417_p9 = scmp.lt.s32.totalorder %s1796_s14, %s1854_s4 }
 0x154   : > { %p1418_p11 = scmp.lt.s32.totalorder %s1416_s25, %s1412_s30 }
 0x155   : > { %p1414_p4 = pnand %p1413_p7, %p1606_p13 }
 0x156   : > { %p1419_p10 = por %p1418_p11, %p1417_p9 }
 0x157   : > { %p1415_p6 = pneg %p1414_p4 }
 0x159   : > { %p1420_p1 = pnand %p1419_p10, %p1415_p6 }
 0x15b   : > { %1423 = shalt.err (!%p1420_p1)
}
 0x15c   : > { %s1489_s8 = smov 128   ;;  %s1490_s9 = smov 8  }
 0x15d   : > { %1273 = dma.vmem_to_hbm [thread:$0]  (%p1606_p13), %s1798_s10, 4096, %s1796_s14, %s944_s11, %s1489_s8, %s1489_s8, %s1490_s9  }
 0x15e PF: > { %s973_s18 = sand.u32 1, %s1462_s15   ;;  %p1872_p8 = scmp.ne.s32.totalorder %s1862_s26, 0 }
 0x15f   : > { %p1873_p12 = scmp.ge.s32.totalorder %s1482_s20, 2  ;;  %s974_s24 = scalar_lea.sflag [#allocation5], %s973_s18 }
 0x161   : > { %p1284_p0 = pnand %p1873_p12, %p1872_p8 }
 0x163   : > { %p1285_p2 = pneg %p1284_p0 }
 0x165   : > { %1457 = dma.done.wait (%p1285_p2), %s974_s24, 4096  }
 0x166   : > { %1459 = vsyncadd (%p1285_p2), %s974_s24, 4294963200  ;;  %s21_s20 = sadd.s32 1, %s1482_s20   ;;  %s1874_s15 = smov %s1466_s16 }
 0x167   : > { %p18_p3 = scmp.ge.s32.totalorder %s21_s20, 4   ;;  %s1875_s16 = smov %s1470_s17 }
 0x168   : > { %s1876_s17 = smov %s1615_s28  ;;  %s1877_s18 = smov %s1478_s19 }
 0x169   : > { %s1878_s19 = smov %s1880_s5  ;;  %20 = sbr.rel (!%p18_p3) target bundleno = 9 (0x9), region = 100 }
 0x16e   :  { %979 = vsyncpa [#allocation4], 1 }
 0x16f   :  { %981 = vsyncpa [#allocation4 + $0x1], 1 }
 0x170   :  { %982 = vsyncpa [#allocation7], 1 }
 0x171   :  { %983 = vsyncpa [#allocation5], 1 }
 0x172   :  { %985 = vsyncpa [#allocation5 + $0x1], 1 }

</bundles_post_ra>
